<compile_context>
chip_gen: v5e
topology: v5e:2x2
jax: 0.10.0
libtpu: 0.0.40
codegen_flags: <defaults>
</compile_context>

<pallas_src>
import functools

import numpy as np
import jax
import jax.numpy as jnp
from jax import lax
from jax.experimental import pallas as pl
from jax.experimental.pallas import tpu as pltpu

NEG_SLOPE = 0.01           # nn.LeakyReLU default
LN_EPS = 1e-5              # nn.LayerNorm default
LANE = 128                 # TPU lane width; channel dims padded to a multiple of this
VMEM_LIMIT = 64 * 1024 * 1024   # raised scoped-VMEM limit (needed once dim >= 64)


def _round_up(x, m):
    return (x + m - 1) // m * m


# ------------------------- layout geometry -------------------------

def _geom(h, w):
    """Flat-extended layout geometry for an HxW activation."""
    hp, wp = h + 2, w + 2
    wpad = _round_up(wp, 8)                    # row stride padded to sublane multiple
    core = hp * wpad                           # zero-padded spatial grid, flattened
    g0 = _round_up(wpad + 1, 8)                # zero guard rows before the core
    mext = _round_up(g0 + core + wpad + 1, 8)  # guard rows after the core as well
    return dict(H=h, W=w, Hp=hp, Wp=wp, Wpad=wpad, core=core, g0=g0, mext=mext)


def _tap_groups(cin, cin_pad):
    """K-packing: each group packs floor(cin_pad/cin) taps into one cin_pad-wide
    K tile, so a 3x3 conv costs ceil(9/taps_per_group) MXU matmuls."""
    tpg = max(1, cin_pad // cin)
    ngroups = -(-9 // tpg)
    return tpg, ngroups


# ------------------------- pltpu.roll direction probe -------------------------

_ROLL_DIR = None


def _roll_direction():
    """+1 if pltpu.roll(x, s, axis) moves lane l -> (l+s) % n (jnp.roll semantics),
    -1 otherwise.  Probed once so the packed-weight layout matches the lowering."""
    global _ROLL_DIR
    if _ROLL_DIR is None:
        def kernel(x_ref, o_ref):
            o_ref[...] = pltpu.roll(x_ref[...], shift=1, axis=1)

        x = jnp.zeros((8, LANE), jnp.float32).at[:, 0].set(1.0)
        out = np.asarray(pl.pallas_call(
            kernel, out_shape=jax.ShapeDtypeStruct((8, LANE), jnp.float32))(x))
        if out[0, 1] == 1.0:
            _ROLL_DIR = 1
        elif out[0, LANE - 1] == 1.0:
            _ROLL_DIR = -1
        else:
            raise RuntimeError("could not determine pltpu.roll direction")
    return _ROLL_DIR


# ------------------------- in-kernel helpers -------------------------

def _interior_rows(core, wpad, h, w):
    """[core, 1] f32 0/1 interior-position mask, generated in-kernel on the VPU
    (replaces the former lane-width-1 mask operand and its extra DMA stream)."""
    p = lax.broadcasted_iota(jnp.int32, (core, 1), 0).astype(jnp.float32)
    y = jnp.floor((p + 0.5) / float(wpad))
    x = p - y * float(wpad)
    ok = (y >= 1.0) & (y <= float(h)) & (x >= 1.0) & (x <= float(w))
    return jnp.where(ok, 1.0, 0.0)


def _packed_group_lhs(src_ref, b, g0, core, shifts, grp, tpg, cin):
    """One K-packed im2col group: sum of lane-rolled full-width tap slices.
    Valid because lanes >= cin of the activation are exactly zero, so rolled taps
    occupy disjoint lane blocks.  Single f32->bf16 cast per group (not per tap)."""
    lhs = None
    for j in range(min(tpg, 9 - grp * tpg)):
        sh = shifts[grp * tpg + j]
        tap = src_ref[b, g0 + sh:g0 + sh + core, :]
        if j:
            tap = pltpu.roll(tap, shift=j * cin, axis=1)
        lhs = tap if lhs is None else lhs + tap
    return lhs.astype(jnp.bfloat16)


# ------------------------- Pallas kernels -------------------------

def _make_conv_kernel(g, cin, tpg, ngroups, bt, cout_pad):
    """3x3 stride-1 conv (+bias) on flat-extended activations; bt samples per step."""
    g0, core, wpad = g["g0"], g["core"], g["Wpad"]
    mext, h, w = g["mext"], g["H"], g["W"]
    shifts = [(dy - 1) * wpad + (dx - 1) for dy in range(3) for dx in range(3)]

    def kernel(x_ref, w_ref, b_ref, o_ref):
        # Zero only the guard rows; the core rows are fully rewritten below.
        o_ref[:, :g0, :] = jnp.zeros((bt, g0, cout_pad), jnp.float32)
        o_ref[:, g0 + core:, :] = jnp.zeros((bt, mext - g0 - core, cout_pad), jnp.float32)
        interior = _interior_rows(core, wpad, h, w)
        bias = b_ref[...]
        for b in range(bt):                              # static unrolled batch tile
            acc = None
            for grp in range(ngroups):
                lhs = _packed_group_lhs(x_ref, b, g0, core, shifts, grp, tpg, cin)
                d = jnp.dot(lhs, w_ref[grp], preferred_element_type=jnp.float32)
                acc = d if acc is None else acc + d
            o_ref[b, g0:g0 + core, :] = (acc + bias) * interior

    return kernel


def _make_block_kernel(g, cin, cpad, tpg, ngroups, n_real, bt):
    """One DiscriminatorBlock: n_layers x (x + LeakyReLU(LayerNorm(conv3x3(x)))).
    grid = (batch_steps, n_layers); the activation stays resident in the output
    VMEM block across the sequential layer axis; conv weights are fully resident;
    bf16 gamma/beta are streamed per layer."""
    g0, core, wpad, h, w = g["g0"], g["core"], g["Wpad"], g["H"], g["W"]
    shifts = [(dy - 1) * wpad + (dx - 1) for dy in range(3) for dx in range(3)]
    inv_n = 1.0 / float(n_real)

    def kernel(x_ref, w_ref, gam_ref, bet_ref, o_ref):
        layer = pl.program_id(1)

        @pl.when(layer == 0)
        def _init():
            o_ref[...] = x_ref[...]

        interior = _interior_rows(core, wpad, h, w)                   # [core, 1]
        lane = lax.broadcasted_iota(jnp.int32, (1, cpad), 1).astype(jnp.float32)
        msk = interior * jnp.where(lane < float(cin), 1.0, 0.0)       # [core, cpad]
        gam = gam_ref[0].astype(jnp.float32)
        bet = bet_ref[0].astype(jnp.float32)

        for b in range(bt):                               # static unrolled batch tile
            # K-packed fused-im2col 3x3 conv over the resident state (bf16 MXU).
            acc = None
            for grp in range(ngroups):
                lhs = _packed_group_lhs(o_ref, b, g0, core, shifts, grp, tpg, cin)
                d = jnp.dot(lhs, w_ref[layer * ngroups + grp],
                            preferred_element_type=jnp.float32)
                acc = d if acc is None else acc + d
            # Two-pass per-sample LayerNorm over the C*H*W real elements (f32).
            mu = jnp.sum(acc * msk) * inv_n
            dev = (acc - mu) * msk
            var = jnp.sum(dev * dev) * inv_n
            yn = (acc - mu) * lax.rsqrt(var + LN_EPS)
            yn = yn * gam + bet                 # gamma/beta are exactly 0 at halo/pad
            act = jnp.where(yn >= 0.0, yn, NEG_SLOPE * yn)
            o_ref[b, g0:g0 + core, :] = o_ref[b, g0:g0 + core, :] + act

    return kernel


# ------------------------- pallas_call wrappers -------------------------

def _conv_call(xf, w_taps, bias, g, cin, bt):
    b, mext, cin_pad = xf.shape
    ngroups, wk, cout_pad = w_taps.shape
    assert wk == cin_pad and b % bt == 0
    tpg, ng2 = _tap_groups(cin, cin_pad)
    assert ng2 == ngroups
    kern = _make_conv_kernel(g, cin, tpg, ngroups, bt, cout_pad)
    return pl.pallas_call(
        kern,
        out_shape=jax.ShapeDtypeStruct((b, mext, cout_pad), jnp.float32),
        grid_spec=pltpu.PrefetchScalarGridSpec(
            num_scalar_prefetch=0,
            grid=(b // bt,),
            in_specs=[
                pl.BlockSpec((bt, mext, cin_pad), lambda i: (i, 0, 0)),
                pl.BlockSpec((ngroups, cin_pad, cout_pad), lambda i: (0, 0, 0)),
                pl.BlockSpec((1, cout_pad), lambda i: (0, 0)),
            ],
            out_specs=pl.BlockSpec((bt, mext, cout_pad), lambda i: (i, 0, 0)),
        ),
        compiler_params=pltpu.CompilerParams(
            dimension_semantics=("parallel",),
            vmem_limit_bytes=VMEM_LIMIT),
    )(xf, w_taps, bias)


def _block_call(xf, w, gamma, beta, g, n_layers, cin, n_real, bt):
    b, mext, cpad = xf.shape
    assert b % bt == 0
    core = g["core"]
    tpg, ngroups = _tap_groups(cin, cpad)
    kern = _make_block_kernel(g, cin, cpad, tpg, ngroups, n_real, bt)
    return pl.pallas_call(
        kern,
        out_shape=jax.ShapeDtypeStruct((b, mext, cpad), jnp.float32),
        grid_spec=pltpu.PrefetchScalarGridSpec(
            num_scalar_prefetch=0,
            grid=(b // bt, n_layers),
            in_specs=[
                pl.BlockSpec((bt, mext, cpad), lambda i, l: (i, 0, 0)),
                # all layers' conv weights resident (layer-independent index map)
                pl.BlockSpec((n_layers * ngroups, cpad, cpad), lambda i, l: (0, 0, 0)),
                pl.BlockSpec((1, core, cpad), lambda i, l: (l, 0, 0)),
                pl.BlockSpec((1, core, cpad), lambda i, l: (l, 0, 0)),
            ],
            out_specs=pl.BlockSpec((bt, mext, cpad), lambda i, l: (i, 0, 0)),
        ),
        input_output_aliases={0: 0},       # activation updated in place (no 2nd HBM buf)
        compiler_params=pltpu.CompilerParams(
            dimension_semantics=("parallel", "arbitrary"),
            vmem_limit_bytes=VMEM_LIMIT),
    )(xf, w, gamma, beta)


# ------------------------- layout glue (wrapper side) -------------------------

def _to_flat_ext(x, g, cpad):
    """[B,H,W,C] NHWC -> flat-extended [B, Mext, cpad] (zero halo / guards / lane pad)."""
    b, h, w, c = x.shape
    xp = jnp.pad(x, ((0, 0), (1, 1), (1, g["Wpad"] - w - 1), (0, cpad - c)))
    flat = xp.reshape(b, g["core"], cpad)
    return jnp.pad(flat, ((0, 0), (g["g0"], g["mext"] - g["g0"] - g["core"]), (0, 0)))


def _from_flat_ext(xf, g, c):
    """flat-extended [B, Mext, cpad] -> [B, H, W, c] (real channels only)."""
    b = xf.shape[0]
    x = xf[:, g["g0"]:g["g0"] + g["core"], :]
    x = x.reshape(b, g["Hp"], g["Wpad"], xf.shape[-1])
    return x[:, 1:g["H"] + 1, 1:g["W"] + 1, :c]


def _space_to_depth(x):
    """[B,H,W,C] -> [B,H/2,W/2,4C] with channel order ((py*2+px)*C + ci)."""
    b, h, w, c = x.shape
    x = x.reshape(b, h // 2, 2, w // 2, 2, c)
    x = jnp.transpose(x, (0, 1, 3, 2, 4, 5))
    return x.reshape(b, h // 2, w // 2, 4 * c)


# ------------------------- parameter preparation (done once) -------------------------

def _taps_dense_3x3(w_torch):
    """torch [Cout,Cin,3,3] -> dense per-tap weights [9, Cin, Cout]."""
    w = np.asarray(w_torch, np.float32)
    return np.transpose(w, (2, 3, 1, 0)).reshape(9, w.shape[1], w.shape[0])


_K4_MAP = {0: (-1, 1), 1: (0, 0), 2: (0, 1), 3: (1, 0)}   # 4x4 tap -> (3x3 offset, parity)


def _taps_dense_down4x4(w_torch):
    """torch [2C,C,4,4] stride-2 weight -> dense 3x3 taps [9, 4C, 2C] on the
    space-to-depth input."""
    w = np.asarray(w_torch, np.float32)
    cout, cin = w.shape[:2]
    taps = np.zeros((9, 4 * cin, cout), np.float32)
    for ky in range(4):
        a, py = _K4_MAP[ky]
        for kx in range(4):
            bq, px = _K4_MAP[kx]
            t = (a + 1) * 3 + (bq + 1)
            q0 = (py * 2 + px) * cin
            taps[t, q0:q0 + cin, :] = np.transpose(w[:, :, ky, kx])
    return taps


def _pack_k_groups(taps, cin_pad, cout_pad):
    """[9, cin, cout] dense taps -> [ngroups, cin_pad, cout_pad] K-packed weights
    matching the in-kernel lane-roll packing (direction-aware via the probe)."""
    _, cin, cout = taps.shape
    tpg, ngroups = _tap_groups(cin, cin_pad)
    rd = _roll_direction()
    out = np.zeros((ngroups, cin_pad, cout_pad), np.float32)
    for t in range(9):
        grp, j = divmod(t, tpg)
        base = (rd * j * cin) % cin_pad
        out[grp, base:base + cin, :cout] = taps[t]
    return out


def _bias_row(bias, cout, cout_pad):
    out = np.zeros((1, cout_pad), np.float32)
    if bias is not None:
        out[0, :cout] = np.asarray(bias, np.float32)
    return out


def _ln_affine_flat(p_torch, c, h, w, wpad, cpad):
    """torch [C,H,W] LayerNorm affine -> flat [(H+2)*wpad, cpad] (exact zeros at halo/pad)."""
    hp = h + 2
    out = np.zeros((hp, wpad, cpad), np.float32)
    out[1:h + 1, 1:w + 1, :c] = np.transpose(np.asarray(p_torch, np.float32), (1, 2, 0))
    return out.reshape(hp * wpad, cpad)


def spectral_normalize(w):
    """nn.utils.spectral_norm semantics: W / sigma_max(W.reshape(Cout, -1))."""
    wn = np.asarray(w, dtype=np.float64)
    sigma = np.linalg.svd(wn.reshape(wn.shape[0], -1), compute_uv=False)[0]
    return np.asarray(wn / sigma, dtype=np.float32)


def init_raw_params(key, dim, n_first_channels, n_layers_block):
    n_blocks = int(np.log2(dim))
    c0 = n_first_channels
    k = key

    def nxt():
        nonlocal k
        k, sub = jax.random.split(k)
        return sub

    def rnd(shape, scale):
        return np.asarray(jax.random.normal(nxt(), shape), np.float32) * np.float32(scale)

    params = {
        "first_w": spectral_normalize(rnd((c0, 3, 3, 3), 0.2)),
        "first_b": rnd((c0,), 0.05),
        "blocks": [],
    }
    for block_id in range(n_blocks):
        c = c0 << block_id
        d = dim >> block_id
        layers = []
        for _ in range(n_layers_block):
            layers.append({
                "w": spectral_normalize(rnd((c, c, 3, 3), 0.2)),
                "gamma": 1.0 + rnd((c, d, d), 0.1),
                "beta": rnd((c, d, d), 0.05),
            })
        params["blocks"].append({
            "layers": layers,
            "down_w": rnd((2 * c, c, 4, 4), 0.5 / float(np.sqrt(16 * c))),
            "down_b": rnd((2 * c,), 0.05),
        })
    params["cls_w"] = spectral_normalize(rnd((1, c0 << n_blocks, 3, 3), 0.2))
    return params


def prepare_params(raw, dim, c0, n_layers_block):
    """Pad / reorder all parameters into kernel-ready layouts (bf16 weights & affines)."""
    n_blocks = int(np.log2(dim))
    prep = {}
    cp0 = _round_up(c0, LANE)
    prep["first"] = {
        "w": jnp.asarray(_pack_k_groups(_taps_dense_3x3(raw["first_w"]), LANE, cp0),
                         jnp.bfloat16),
        "b": jnp.asarray(_bias_row(raw["first_b"], c0, cp0)),
    }
    prep["blocks"] = []
    for bi, blk in enumerate(raw["blocks"]):
        c = c0 << bi
        d = dim >> bi
        cp = _round_up(c, LANE)
        g = _geom(d, d)
        w = np.concatenate(
            [_pack_k_groups(_taps_dense_3x3(l["w"]), cp, cp) for l in blk["layers"]], axis=0)
        gamma = np.stack([_ln_affine_flat(l["gamma"], c, d, d, g["Wpad"], cp)
                          for l in blk["layers"]])
        beta = np.stack([_ln_affine_flat(l["beta"], c, d, d, g["Wpad"], cp)
                         for l in blk["layers"]])
        cds_in = _round_up(4 * c, LANE)
        cds_out = _round_up(2 * c, LANE)
        prep["blocks"].append({
            "w": jnp.asarray(w, jnp.bfloat16),
            "gamma": jnp.asarray(gamma, jnp.bfloat16),
            "beta": jnp.asarray(beta, jnp.bfloat16),
            "down_w": jnp.asarray(
                _pack_k_groups(_taps_dense_down4x4(blk["down_w"]), cds_in, cds_out),
                jnp.bfloat16),
            "down_b": jnp.asarray(_bias_row(blk["down_b"], 2 * c, cds_out)),
        })
    c_last = c0 << n_blocks
    prep["cls"] = {
        "w": jnp.asarray(
            _pack_k_groups(_taps_dense_3x3(raw["cls_w"]), _round_up(c_last, LANE), LANE),
            jnp.bfloat16),
        "b": jnp.asarray(_bias_row(None, 1, LANE)),
    }
    return prep


# ------------------------- forward passes -------------------------

def discriminator_forward(prep, cfg, x_nchw, batch_tile=None):
    """Pallas forward.  x_nchw: [B, 3, dim, dim] -> logits [B, 1]."""
    dim, c0, n_layers, n_blocks = cfg
    b = x_nchw.shape[0]
    bt = b if batch_tile is None else batch_tile
    assert b % bt == 0
    # Dropout is the identity (eval mode); spectral norm is baked into the weights.
    x = jnp.transpose(x_nchw, (0, 2, 3, 1)).astype(jnp.float32)      # NCHW -> NHWC
    g = _geom(dim, dim)
    xf = _to_flat_ext(x, g, LANE)
    xf = _conv_call(xf, prep["first"]["w"], prep["first"]["b"], g, 3, bt)

    c, d = c0, dim
    for bi in range(n_blocks):
        blk = prep["blocks"][bi]
        g = _geom(d, d)
        xf = _block_call(xf, blk["w"], blk["gamma"], blk["beta"], g,
                         n_layers, c, c * d * d, bt)
        # 4x4 stride-2 downsample == 3x3 stride-1 conv on space_to_depth(x).
        # TODO(synk): fuse the space-to-depth relayout into the block / down-conv
        # kernels to remove these wrapper-side XLA HBM passes per block.
        xi = _from_flat_ext(xf, g, c)
        z = _space_to_depth(xi)
        d //= 2
        g = _geom(d, d)
        zf = _to_flat_ext(z, g, _round_up(4 * c, LANE))
        xf = _conv_call(zf, blk["down_w"], blk["down_b"], g, 4 * c, bt)
        c *= 2

    g = _geom(d, d)
    xf = _conv_call(xf, prep["cls"]["w"], prep["cls"]["b"], g, c, bt)
    y = _from_flat_ext(xf, g, 1)                                     # [B, 1, 1, 1]
    return y.reshape(b, -1)                                          # Flatten -> [B, 1]


def _ref_conv(x, w_torch, bias, stride, pad):
    w = jnp.transpose(jnp.asarray(w_torch), (2, 3, 1, 0))            # HWIO
    y = jax.lax.conv_general_dilated(
        x, w, (stride, stride), ((pad, pad), (pad, pad)),
        dimension_numbers=("NHWC", "HWIO", "NHWC"))
    if bias is not None:
        y = y + jnp.asarray(bias).reshape(1, 1, 1, -1)
    return y


def reference_forward(raw, x_nchw):
    """Pure-JAX f32 reference (lax.conv) used only to validate the Pallas path."""
    x = jnp.transpose(x_nchw, (0, 2, 3, 1)).astype(jnp.float32)
    x = _ref_conv(x, raw["first_w"], raw["first_b"], 1, 1)
    for blk in raw["blocks"]:
        for layer in blk["layers"]:
            y = _ref_conv(x, layer["w"], None, 1, 1)
            mu = jnp.mean(y, axis=(1, 2, 3), keepdims=True)
            var = jnp.mean((y - mu) ** 2, axis=(1, 2, 3), keepdims=True)
            yn = (y - mu) * jax.lax.rsqrt(var + LN_EPS)
            yn = yn * jnp.transpose(jnp.asarray(layer["gamma"]), (1, 2, 0))[None] \
                 + jnp.transpose(jnp.asarray(layer["beta"]), (1, 2, 0))[None]
            x = x + jnp.where(yn >= 0, yn, NEG_SLOPE * yn)
        x = _ref_conv(x, blk["down_w"], blk["down_b"], 2, 1)
    y = _ref_conv(x, raw["cls_w"], None, 1, 1)
    return y.reshape(x.shape[0], -1)


# ------------------------- main -------------------------

def _run_case(dim, c0, n_layers, batch, batch_tile, key):
    n_blocks = int(np.log2(dim))
    kp, kx = jax.random.split(key)
    raw = init_raw_params(kp, dim, c0, n_layers)
    prep = prepare_params(raw, dim, c0, n_layers)
    cfg = (dim, c0, n_layers, n_blocks)
    x = jax.random.normal(kx, (batch, 3, dim, dim), dtype=jnp.float32)

    fwd = jax.jit(functools.partial(discriminator_forward, prep, cfg,
                                    batch_tile=batch_tile))
    out = jax.block_until_ready(fwd(x))
    ref = jax.block_until_ready(reference_forward(raw, x))
    assert out.shape == (batch, 1), f"unexpected output shape {out.shape}"
    # bf16 MXU inputs / bf16 affines (f32 accumulation) vs an all-f32 reference.
    assert np.allclose(np.asarray(out), np.asarray(ref), atol=1e-1, rtol=1e-1), \
        f"Pallas vs reference mismatch (dim={dim}):\n{out}\n{ref}"


if __name__ == "__main__":
    key = jax.random.PRNGKey(0)
    k1, k2 = jax.random.split(key)
    # Case 1: whole batch per grid step (amortizes per-step overhead at tiny shapes).
    _run_case(dim=8, c0=4, n_layers=2, batch=2, batch_tile=None, key=k1)
    # Case 2: different channel counts / K-group counts, 2 samples per batch step
    # (2 "parallel" batch grid steps -> both TensorCores usable on v7x).
    _run_case(dim=4, c0=8, n_layers=1, batch=4, batch_tile=2, key=k2)
    print("KERNEL_OK")
</pallas_src>

<mosaic_0001>
module attributes {stable_mosaic.version = 11 : i64} {
  func.func @kernel(%arg0: memref<8x128xf32, #tpu.memory_space<vmem>>, %arg1: memref<8x128xf32, #tpu.memory_space<vmem>>) attributes {dimension_semantics = [], scalar_prefetch = 0 : i64, scratch_operands = 0 : i64, tpu.core_type = #tpu.core_type<tc>} {
    %c0 = arith.constant 0 : index
    %c0_0 = arith.constant 0 : index
    %0 = vector.load %arg0[%c0, %c0_0] : memref<8x128xf32, #tpu.memory_space<vmem>>, vector<8x128xf32>
    %c1_i32 = arith.constant 1 : i32
    %1 = tpu.dynamic_rotate %0 by %c1_i32 dim 1 : vector<8x128xf32>, i32 -> vector<8x128xf32>
    %c0_1 = arith.constant 0 : index
    %c0_2 = arith.constant 0 : index
    %2 = vector.load %arg1[%c0_1, %c0_2] : memref<8x128xf32, #tpu.memory_space<vmem>>, vector<8x128xf32>
    tpu.vector_store %arg1[%c0_1, %c0_2], %1 {strides = array<i32>} : memref<8x128xf32, #tpu.memory_space<vmem>>, vector<8x128xf32>,
    return
  }
}

</mosaic_0001>

<bundles_post_ra>
// kernel: tpu_custom_call.1
= control target key start
LH: loop header
LB: loop body
LE: loop exit
PB: predicated region body
PF: predicated region fallthrough
CT: control target
= control target key end

     0   :  { %6 = vsyncpa [#allocation3], 0  ;;  %s118_s0 = inlined_call_operand.hbm [shape: f32[8,128], index: 0, kind: input, shape index: {}]   ;;  %s119_s1 = inlined_call_operand.hbm [shape: f32[8,128], index: 1, kind: output, shape index: {}]  }
   0x1   :  { %7 = vsyncpa [#allocation4], 0  ;;  %s13_s8 = sshll.u32 %s118_s0, 4  ;;  %s99_s9 = smov [#allocation2]   ;;  %s14_s8 = int_to_ptr.hbm [resolvable:$true] %s13_s8 }
   0x2   :  { %s15_s10 = sshll.u32 %s99_s9, 4  ;;  %s16_s10 = int_to_ptr.vmem [resolvable:$true] %s15_s10 }
   0x3   :  { %18 = dma.hbm_to_vmem [thread:$0]  %s14_s8, 128, %s16_s10, [#allocation3]  }
   0x4   :  { %95 = dma.done.wait [#allocation3], 128  }
   0x5   :  { %96 = vsyncadd [#allocation3], 4294967168  ;;  %v23_v0 = vld [vmem:[#allocation2] sm:$0xff]  ;;  %s100_s11 = smov 1   ;;  %s101_s12 = smov [#allocation5]  }
   0x6   :  { %24 = vrot.lane.b32.xlu0 %v23_v0, %s100_s11  ;;  %s32_s13 = sshll.u32 %s101_s12, 4  ;;  %s34_s16 = sshll.u32 %s119_s1, 4  ;;  %s33_s13 = int_to_ptr.vmem [resolvable:$true] %s32_s13  ;;  %s35_s16 = int_to_ptr.hbm [resolvable:$true] %s34_s16 }
  0x78   :  { %v25_v1 = vpop.permute.xlu0 %24 }
  0x79   :  { %26 = vst [vmem:[#allocation5] sm:$0xff] %v25_v1 }
  0x7a   :  { %37 = dma.vmem_to_hbm [thread:$0]  %s33_s13, 128, %s35_s16, [#allocation4]  }
  0x7b   :  { %97 = dma.done.wait [#allocation4], 128  }
  0x7c   :  { %98 = vsyncadd [#allocation4], 4294967168 }
  0x7d   :  { %42 = vsyncpa [#allocation3], 1 }
  0x7e   :  { %43 = vsyncpa [#allocation4], 1 }

</bundles_post_ra>
